<compile_context>
chip_gen: v7x
topology: tpu7x:2x2x1
jax: 0.10.0
libtpu: 0.0.40
codegen_flags: <defaults>
</compile_context>

<pallas_src>
import jax
import jax.numpy as jnp
from jax.experimental import pallas as pl
from jax.experimental.pallas import tpu as pltpu

HIDDEN = 128       # hidden_size of the Critic
LN_EPS = 1e-5      # nn.LayerNorm default eps


def _round_up(x, m):
    return (x + m - 1) // m * m


def critic_kernel(x_ref, w1_ref, b1_ref, g_ref, beta_ref,
                  w2_ref, b2_ref, w3_ref, b3_ref, o_ref):
    # ---- Linear(2 -> H) as two VPU FMAs (K=2 would waste a full MXU push) ----
    x = x_ref[...]                                                       # (TB, 2) f32
    h = (x[:, 0:1] * w1_ref[0:1, :]
         + x[:, 1:2] * w1_ref[1:2, :]
         + b1_ref[...])                                                  # (TB, H) f32

    # ---- LayerNorm(H), single-pass stats: var = E[h^2] - mean^2 ----
    mean = jnp.mean(h, axis=-1, keepdims=True)                           # (TB, 1)
    mean_sq = jnp.mean(h * h, axis=-1, keepdims=True)                    # (TB, 1)
    var = mean_sq - mean * mean
    inv = jax.lax.rsqrt(var + LN_EPS)                                    # EUP
    h = (h - mean) * inv * g_ref[...] + beta_ref[...]                    # (TB, H)

    # ---- ReLU ----
    h = jnp.maximum(h, 0.0)

    # ---- Linear(H -> H) on the MXU, bf16 operands, f32 accumulation ----
    h = jnp.dot(h.astype(jnp.bfloat16), w2_ref[...],
                preferred_element_type=jnp.float32) + b2_ref[...]        # (TB, H) f32
    h = jnp.maximum(h, 0.0)

    # ---- Linear(H -> 1) as elementwise mul + lane reduction (keeps MXU free) ----
    out = jnp.sum(h * w3_ref[...], axis=-1, keepdims=True) + b3_ref[...]  # (TB, 1)
    o_ref[...] = out.astype(o_ref.dtype)


def critic_forward(s, params, *, block_b=512):
    """s: (B, 2) float32. Returns (B, 1) float32."""
    w1, b1, g, beta, w2, b2, w3, b3 = params
    B = s.shape[0]
    H = w1.shape[1]

    # Batch tile: multiple of 8 sublanes, capped at block_b; pad B up to a tile multiple.
    TB = min(block_b, _round_up(B, 8))
    Bp = _round_up(B, TB)
    if Bp != B:
        s = jnp.pad(s, ((0, Bp - B), (0, 0)))
    grid = (Bp // TB,)

    # Ship the H x H weight in bf16 (MXU-native on v6e/v7x; f32 accumulation in-kernel).
    w2_bf16 = w2.astype(jnp.bfloat16)

    # Weights / LN params: full-array blocks, constant index_map -> VMEM-resident.
    def resident(shape):
        return pl.BlockSpec(shape, lambda i: (0,) * len(shape))

    # Advisory cost estimate (helps XLA schedule this small custom call).
    flops = 2 * Bp * H * (H + 3) + 6 * Bp * H
    bytes_accessed = (
        Bp * 2 * 4 + Bp * 1 * 4                                    # input + output
        + int(w1.size + b1.size + g.size + beta.size
              + b2.size + w3.size + b3.size) * 4
        + int(w2.size) * 2                                         # bf16 weights
    )
    cost = pl.CostEstimate(flops=flops, transcendentals=Bp,
                           bytes_accessed=bytes_accessed)

    out = pl.pallas_call(
        critic_kernel,
        out_shape=jax.ShapeDtypeStruct((Bp, 1), jnp.float32),
        grid=grid,
        in_specs=[
            pl.BlockSpec((TB, 2), lambda i: (i, 0)),   # x tile, batch-indexed
            resident(w1.shape),                        # (2, H)
            resident(b1.shape),                        # (1, H)
            resident(g.shape),                         # (1, H)
            resident(beta.shape),                      # (1, H)
            resident(w2.shape),                        # (H, H) bf16
            resident(b2.shape),                        # (1, H)
            resident(w3.shape),                        # (1, H)
            resident(b3.shape),                        # (1, 1)
        ],
        out_specs=pl.BlockSpec((TB, 1), lambda i: (i, 0)),
        compiler_params=pltpu.CompilerParams(
            dimension_semantics=("parallel",)),        # megacore sharding on v7x
        cost_estimate=cost,
    )(s, w1, b1, g, beta, w2_bf16, b2, w3, b3)

    return out[:B]


def init_params(key, hidden=HIDDEN):
    """Deterministic init mimicking PyTorch's default Linear init."""
    ks = jax.random.split(key, 6)

    def lin(kw, kb, fan_in, fan_out):
        bound = 1.0 / jnp.sqrt(fan_in)
        w = jax.random.uniform(kw, (fan_in, fan_out), jnp.float32, -bound, bound)
        b = jax.random.uniform(kb, (1, fan_out), jnp.float32, -bound, bound)
        return w, b

    w1, b1 = lin(ks[0], ks[1], 2, hidden)
    gamma = jnp.ones((1, hidden), jnp.float32)    # LayerNorm weight
    beta = jnp.zeros((1, hidden), jnp.float32)    # LayerNorm bias
    w2, b2 = lin(ks[2], ks[3], hidden, hidden)
    w3_col, b3 = lin(ks[4], ks[5], hidden, 1)
    w3 = w3_col.reshape(1, hidden)                # keep final weight as a (1, H) row
    return (w1, b1, gamma, beta, w2, b2, w3, b3)


def critic_ref(s, params):
    """Pure-JAX f32 reference (matches the PyTorch module semantics)."""
    w1, b1, g, beta, w2, b2, w3, b3 = params
    h = s @ w1 + b1
    mean = jnp.mean(h, axis=-1, keepdims=True)
    var = jnp.mean((h - mean) ** 2, axis=-1, keepdims=True)
    h = (h - mean) / jnp.sqrt(var + LN_EPS) * g + beta
    h = jnp.maximum(h, 0.0)
    h = jnp.maximum(h @ w2 + b2, 0.0)
    return jnp.sum(h * w3, axis=-1, keepdims=True) + b3


if __name__ == "__main__":
    key = jax.random.PRNGKey(0)
    k_param, k_x = jax.random.split(key)

    params = init_params(k_param)
    B = 8
    s = jax.random.normal(k_x, (B, 2), jnp.float32)   # (batch, state_dim=2)

    out = jax.block_until_ready(critic_forward(s, params))
    ref = critic_ref(s, params)

    assert out.shape == (B, 1), out.shape
    # bf16 operands on the H->H matmul -> looser tolerance than pure-f32.
    assert jnp.allclose(out, ref, atol=2e-2, rtol=2e-2), (out, ref)

    print("KERNEL_OK")
</pallas_src>

<mosaic_0001>
module attributes {stable_mosaic.version = 11 : i64} {
  func.func @critic_kernel(%arg0: i32, %arg1: memref<8x2xf32, #tpu.memory_space<vmem>>, %arg2: memref<2x128xf32, #tpu.memory_space<vmem>>, %arg3: memref<1x128xf32, #tpu.memory_space<vmem>>, %arg4: memref<1x128xf32, #tpu.memory_space<vmem>>, %arg5: memref<1x128xf32, #tpu.memory_space<vmem>>, %arg6: memref<128x128xbf16, #tpu.memory_space<vmem>>, %arg7: memref<1x128xf32, #tpu.memory_space<vmem>>, %arg8: memref<1x128xf32, #tpu.memory_space<vmem>>, %arg9: memref<1x1xf32, #tpu.memory_space<vmem>>, %arg10: memref<8x1xf32, #tpu.memory_space<vmem>>) attributes {dimension_semantics = [#tpu.dimension_semantics<parallel>], iteration_bounds = array<i64: 1>, scalar_prefetch = 0 : i64, scratch_operands = 0 : i64, tpu.core_type = #tpu.core_type<tc>, window_params = [{transform_indices = @transform_0, window_bounds = array<i64: 8, 2>}, {pipeline_mode = #tpu.pipeline_mode<synchronous>, transform_indices = @transform_1, window_bounds = array<i64: 2, 128>}, {pipeline_mode = #tpu.pipeline_mode<synchronous>, transform_indices = @transform_2, window_bounds = array<i64: 1, 128>}, {pipeline_mode = #tpu.pipeline_mode<synchronous>, transform_indices = @transform_3, window_bounds = array<i64: 1, 128>}, {pipeline_mode = #tpu.pipeline_mode<synchronous>, transform_indices = @transform_4, window_bounds = array<i64: 1, 128>}, {pipeline_mode = #tpu.pipeline_mode<synchronous>, transform_indices = @transform_5, window_bounds = array<i64: 128, 128>}, {pipeline_mode = #tpu.pipeline_mode<synchronous>, transform_indices = @transform_6, window_bounds = array<i64: 1, 128>}, {pipeline_mode = #tpu.pipeline_mode<synchronous>, transform_indices = @transform_7, window_bounds = array<i64: 1, 128>}, {pipeline_mode = #tpu.pipeline_mode<synchronous>, transform_indices = @transform_8, window_bounds = array<i64: 1, 1>}, {transform_indices = @transform_9, window_bounds = array<i64: 8, 1>}]} {
    %c0 = arith.constant 0 : index
    %c0_0 = arith.constant 0 : index
    %0 = vector.load %arg1[%c0, %c0_0] : memref<8x2xf32, #tpu.memory_space<vmem>>, vector<8x2xf32>
    %1 = vector.extract_strided_slice %0 {offsets = [0, 0], sizes = [8, 1], strides = [1, 1]} : vector<8x2xf32> to vector<8x1xf32>
    %c0_1 = arith.constant 0 : index
    %c0_2 = arith.constant 0 : index
    %2 = vector.load %arg2[%c0_1, %c0_2] : memref<2x128xf32, #tpu.memory_space<vmem>>, vector<1x128xf32>
    %3 = vector.broadcast %1 : vector<8x1xf32> to vector<8x128xf32>
    %4 = vector.broadcast %2 : vector<1x128xf32> to vector<8x128xf32>
    %5 = arith.mulf %3, %4 : vector<8x128xf32>
    %6 = vector.extract_strided_slice %0 {offsets = [0, 1], sizes = [8, 1], strides = [1, 1]} : vector<8x2xf32> to vector<8x1xf32>
    %c1 = arith.constant 1 : index
    %c0_3 = arith.constant 0 : index
    %7 = vector.load %arg2[%c1, %c0_3] : memref<2x128xf32, #tpu.memory_space<vmem>>, vector<1x128xf32>
    %8 = vector.broadcast %6 : vector<8x1xf32> to vector<8x128xf32>
    %9 = vector.broadcast %7 : vector<1x128xf32> to vector<8x128xf32>
    %10 = arith.mulf %8, %9 : vector<8x128xf32>
    %11 = arith.addf %5, %10 : vector<8x128xf32>
    %c0_4 = arith.constant 0 : index
    %c0_5 = arith.constant 0 : index
    %12 = vector.load %arg3[%c0_4, %c0_5] : memref<1x128xf32, #tpu.memory_space<vmem>>, vector<1x128xf32>
    %13 = vector.broadcast %12 : vector<1x128xf32> to vector<8x128xf32>
    %14 = arith.addf %11, %13 : vector<8x128xf32>
    %cst = arith.constant dense<0.000000e+00> : vector<8xf32>
    %15 = vector.multi_reduction <add>, %14, %cst [1] : vector<8x128xf32> to vector<8xf32>
    %16 = vector.shape_cast %15 : vector<8xf32> to vector<8x1xf32>
    %cst_6 = arith.constant 1.280000e+02 : f32
    %17 = vector.broadcast %cst_6 : f32 to vector<8x1xf32>
    %18 = arith.divf %16, %17 : vector<8x1xf32>
    %19 = arith.mulf %14, %14 : vector<8x128xf32>
    %cst_7 = arith.constant dense<0.000000e+00> : vector<8xf32>
    %20 = vector.multi_reduction <add>, %19, %cst_7 [1] : vector<8x128xf32> to vector<8xf32>
    %21 = vector.shape_cast %20 : vector<8xf32> to vector<8x1xf32>
    %cst_8 = arith.constant 1.280000e+02 : f32
    %22 = vector.broadcast %cst_8 : f32 to vector<8x1xf32>
    %23 = arith.divf %21, %22 : vector<8x1xf32>
    %24 = arith.mulf %18, %18 : vector<8x1xf32>
    %25 = arith.subf %23, %24 : vector<8x1xf32>
    %cst_9 = arith.constant 9.99999974E-6 : f32
    %26 = vector.broadcast %cst_9 : f32 to vector<8x1xf32>
    %27 = arith.addf %25, %26 : vector<8x1xf32>
    %28 = math.rsqrt %27 : vector<8x1xf32>
    %29 = vector.broadcast %18 : vector<8x1xf32> to vector<8x128xf32>
    %30 = arith.subf %14, %29 : vector<8x128xf32>
    %31 = vector.broadcast %28 : vector<8x1xf32> to vector<8x128xf32>
    %32 = arith.mulf %30, %31 : vector<8x128xf32>
    %c0_10 = arith.constant 0 : index
    %c0_11 = arith.constant 0 : index
    %33 = vector.load %arg4[%c0_10, %c0_11] : memref<1x128xf32, #tpu.memory_space<vmem>>, vector<1x128xf32>
    %34 = vector.broadcast %33 : vector<1x128xf32> to vector<8x128xf32>
    %35 = arith.mulf %32, %34 : vector<8x128xf32>
    %c0_12 = arith.constant 0 : index
    %c0_13 = arith.constant 0 : index
    %36 = vector.load %arg5[%c0_12, %c0_13] : memref<1x128xf32, #tpu.memory_space<vmem>>, vector<1x128xf32>
    %37 = vector.broadcast %36 : vector<1x128xf32> to vector<8x128xf32>
    %38 = arith.addf %35, %37 : vector<8x128xf32>
    %cst_14 = arith.constant 0.000000e+00 : f32
    %39 = vector.broadcast %cst_14 : f32 to vector<8x128xf32>
    %40 = arith.maximumf %38, %39 : vector<8x128xf32>
    %41 = arith.truncf %40 : vector<8x128xf32> to vector<8x128xbf16>
    %c0_15 = arith.constant 0 : index
    %c0_16 = arith.constant 0 : index
    %42 = vector.load %arg6[%c0_15, %c0_16] : memref<128x128xbf16, #tpu.memory_space<vmem>>, vector<128x128xbf16>
    %cst_17 = arith.constant dense<0.000000e+00> : vector<8x128xf32>
    %43 = tpu.matmul %41, %42, %cst_17 {dimension_numbers = #tpu.dot_dimension_numbers<[1], [0], [0], [1], [0, 0, 1, 1], [], []>} : vector<8x128xbf16>, vector<128x128xbf16>, vector<8x128xf32> -> vector<8x128xf32>
    %c0_18 = arith.constant 0 : index
    %c0_19 = arith.constant 0 : index
    %44 = vector.load %arg7[%c0_18, %c0_19] : memref<1x128xf32, #tpu.memory_space<vmem>>, vector<1x128xf32>
    %45 = vector.broadcast %44 : vector<1x128xf32> to vector<8x128xf32>
    %46 = arith.addf %43, %45 : vector<8x128xf32>
    %cst_20 = arith.constant 0.000000e+00 : f32
    %47 = vector.broadcast %cst_20 : f32 to vector<8x128xf32>
    %48 = arith.maximumf %46, %47 : vector<8x128xf32>
    %c0_21 = arith.constant 0 : index
    %c0_22 = arith.constant 0 : index
    %49 = vector.load %arg8[%c0_21, %c0_22] : memref<1x128xf32, #tpu.memory_space<vmem>>, vector<1x128xf32>
    %50 = vector.broadcast %49 : vector<1x128xf32> to vector<8x128xf32>
    %51 = arith.mulf %48, %50 : vector<8x128xf32>
    %cst_23 = arith.constant dense<0.000000e+00> : vector<8xf32>
    %52 = vector.multi_reduction <add>, %51, %cst_23 [1] : vector<8x128xf32> to vector<8xf32>
    %53 = vector.shape_cast %52 : vector<8xf32> to vector<8x1xf32>
    %c0_24 = arith.constant 0 : index
    %c0_25 = arith.constant 0 : index
    %54 = vector.load %arg9[%c0_24, %c0_25] : memref<1x1xf32, #tpu.memory_space<vmem>>, vector<1x1xf32>
    %55 = vector.broadcast %54 : vector<1x1xf32> to vector<8x1xf32>
    %56 = arith.addf %53, %55 : vector<8x1xf32>
    %c0_26 = arith.constant 0 : index
    %c0_27 = arith.constant 0 : index
    %57 = vector.load %arg10[%c0_26, %c0_27] : memref<8x1xf32, #tpu.memory_space<vmem>>, vector<8x1xf32>
    tpu.vector_store %arg10[%c0_26, %c0_27], %56 {strides = array<i32>} : memref<8x1xf32, #tpu.memory_space<vmem>>, vector<8x1xf32>,
    return
  }
  func.func @transform_0(%arg0: i32) -> (i32, i32) {
    %c0_i32 = arith.constant 0 : i32
    %c0_i32_0 = arith.constant 0 : i32
    return %arg0, %c0_i32 : i32, i32
  }
  func.func @transform_1(%arg0: i32) -> (i32, i32) {
    %c0_i32 = arith.constant 0 : i32
    %c0_i32_0 = arith.constant 0 : i32
    %c0_i32_1 = arith.constant 0 : i32
    return %c0_i32, %c0_i32_0 : i32, i32
  }
  func.func @transform_2(%arg0: i32) -> (i32, i32) {
    %c0_i32 = arith.constant 0 : i32
    %c0_i32_0 = arith.constant 0 : i32
    %c0_i32_1 = arith.constant 0 : i32
    return %c0_i32, %c0_i32_0 : i32, i32
  }
  func.func @transform_3(%arg0: i32) -> (i32, i32) {
    %c0_i32 = arith.constant 0 : i32
    %c0_i32_0 = arith.constant 0 : i32
    %c0_i32_1 = arith.constant 0 : i32
    return %c0_i32, %c0_i32_0 : i32, i32
  }
  func.func @transform_4(%arg0: i32) -> (i32, i32) {
    %c0_i32 = arith.constant 0 : i32
    %c0_i32_0 = arith.constant 0 : i32
    %c0_i32_1 = arith.constant 0 : i32
    return %c0_i32, %c0_i32_0 : i32, i32
  }
  func.func @transform_5(%arg0: i32) -> (i32, i32) {
    %c0_i32 = arith.constant 0 : i32
    %c0_i32_0 = arith.constant 0 : i32
    %c0_i32_1 = arith.constant 0 : i32
    return %c0_i32, %c0_i32_0 : i32, i32
  }
  func.func @transform_6(%arg0: i32) -> (i32, i32) {
    %c0_i32 = arith.constant 0 : i32
    %c0_i32_0 = arith.constant 0 : i32
    %c0_i32_1 = arith.constant 0 : i32
    return %c0_i32, %c0_i32_0 : i32, i32
  }
  func.func @transform_7(%arg0: i32) -> (i32, i32) {
    %c0_i32 = arith.constant 0 : i32
    %c0_i32_0 = arith.constant 0 : i32
    %c0_i32_1 = arith.constant 0 : i32
    return %c0_i32, %c0_i32_0 : i32, i32
  }
  func.func @transform_8(%arg0: i32) -> (i32, i32) {
    %c0_i32 = arith.constant 0 : i32
    %c0_i32_0 = arith.constant 0 : i32
    %c0_i32_1 = arith.constant 0 : i32
    return %c0_i32, %c0_i32_0 : i32, i32
  }
  func.func @transform_9(%arg0: i32) -> (i32, i32) {
    %c0_i32 = arith.constant 0 : i32
    %c0_i32_0 = arith.constant 0 : i32
    return %arg0, %c0_i32 : i32, i32
  }
}

</mosaic_0001>

<bundles_post_ra>
// kernel: tpu_custom_call.1
= control target key start
LH: loop header
LB: loop body
LE: loop exit
PB: predicated region body
PF: predicated region fallthrough
CT: control target
= control target key end

     0   :  { %s436_s0 = inlined_call_operand.vmem [shape: f32[8,2], index: 0, kind: input, shape index: {}]   ;;  %s437_s1 = inlined_call_operand.vmem [shape: f32[2,128], index: 1, kind: input, shape index: {}]   ;;  %s438_s2 = inlined_call_operand.vmem [shape: f32[1,128], index: 2, kind: input, shape index: {}]   ;;  %s439_s3 = inlined_call_operand.vmem [shape: f32[1,128], index: 3, kind: input, shape index: {}]   ;;  %s440_s4 = inlined_call_operand.vmem [shape: f32[1,128], index: 4, kind: input, shape index: {}]   ;;  %s441_s5 = inlined_call_operand.hbm [shape: bf16[128,128], index: 5, kind: input, shape index: {}]   ;;  %s442_s6 = inlined_call_operand.vmem [shape: f32[1,128], index: 6, kind: input, shape index: {}]   ;;  %s443_s7 = inlined_call_operand.vmem [shape: f32[1,128], index: 7, kind: input, shape index: {}]   ;;  %s444_s8 = inlined_call_operand.<no memory space> [shape: f32[1,1], index: 8, kind: input, shape index: {}]   ;;  %s445_s9 = inlined_call_operand.vmem [shape: f32[8,1], index: 9, kind: output, shape index: {}]  }
   0x1   :  { %v14_v0 = vstv %s444_s8 }
   0x2   :  { %15 = vst [vmem:[#allocation2] sm:$0x1] %v14_v0 }
   0x3   :  { %16 = vsyncpa [#allocation4], 0  ;;  %s337_s11 = smov [#allocation3]   ;;  %s313_s15 = scalar_lea.hbm %s441_s5, 1024 }
   0x4   :  { %s32_s12 = sshll.u32 %s337_s11, 4  ;;  %p314_p0 = scmp.ne.s32.totalorder %s441_s5, %s313_s15  ;;  %s33_s12 = int_to_ptr.vmem [resolvable:$true] %s32_s12 }
   0x5   :  { %p317_p1 = scmp.lt.u32.totalorder %s313_s15, %s441_s5 }
   0x7   :  { %p319_p2 = pnand %p317_p1, %p314_p0 }
   0x9   :  { %322 = shalt.err (!%p319_p2)
}
   0xa   :  { %s323_s8 = scalar_lea.vmem %s33_s12, 1024  ;;  %p328_p4 = scmp.lt.s32.totalorder %s33_s12, %s33_s12 }
   0xb   :  { %p324_p3 = scmp.ne.s32.totalorder %s33_s12, %s323_s8  ;;  %p329_p5 = scmp.lt.s32.totalorder %s323_s8, %s323_s8 }
   0xd   :  { %p330_p6 = por %p329_p5, %p328_p4 }
   0xf   :  { %p331_p7 = pnand %p330_p6, %p324_p3 }
  0x11   :  { %334 = shalt.err (!%p331_p7)
}
  0x12   :  { %s338_s20 = smov 64   ;;  %s339_s21 = smov 4  }
  0x13   :  { %38 = dma.hbm_to_vmem [thread:$0]  %s441_s5, 1024, %s33_s12, [#allocation4], %s338_s20, %s338_s20, %s339_s21  }
  0x14   :  { %335 = dma.done.wait [#allocation4], 1024  }
  0x15   :  { %336 = vsyncadd [#allocation4], 4294966272  ;;  %v340_v1 = vmov 0   ;;  %v49_v2 = vld [vmem:[%s436_s0] sm:$0xff]  ;;  %v341_v3 = vmov 1   ;;  %v342_v4 = vmov 0.0  }
  0x16   :  { %301 = vset.pattern.permute.xlu0 %v340_v1  ;;  %274 = vmatprep.subr.bf16.mxu0 %v342_v4  ;;  %v249_v6 = vld [vmem:[%s437_s1] ss:$0 sm:$0xff]  ;;  %v250_v7 = vld [vmem:[%s437_s1 + $0x1] ss:$0 sm:$0xff]  ;;  %v304_v16 = vld [vmem:[#allocation3 + $0x8] sm:$0xff]   ;;  %vm343_vm0 = vmmov 0  }
  0x17   :  { %53 = vperm.xlu0 %301, %v49_v2   ;;  %v251_v11 = vld [vmem:[%s438_s2] ss:$0 sm:$0xff]  ;;  %v303_v15 = vld [vmem:[#allocation3] sm:$0xff]   ;;  %v305_v17 = vld [vmem:[#allocation3 + $0x10] sm:$0xff]   ;;  %290 = vmatprep.mubr.msk.bf16.mxu0 %vm343_vm0, %v342_v4  ;;  %vm242_vm1 = vcmask 7168  }
  0x18   :  { %275 = vmatpush3.bf16.msra.mxu0 %v303_v15  ;;  %v306_v18 = vld [vmem:[#allocation3 + $0x18] sm:$0xff]   ;;  %v307_v19 = vld [vmem:[#allocation3 + $0x20] sm:$0xff]   ;;  %v308_v20 = vld [vmem:[#allocation3 + $0x28] sm:$0xff]  }
  0x19   :  { %276 = vmatprep.subr.bf16.mxu0 %v342_v4  ;;  %v309_v21 = vld [vmem:[#allocation3 + $0x30] sm:$0xff]   ;;  %v310_v22 = vld [vmem:[#allocation3 + $0x38] sm:$0xff]  }
  0x1a   :  { %v252_v32 = vld [vmem:[%s439_s3] ss:$0 sm:$0xff] }
  0x1b   :  { %302 = vset.pattern.permute.xlu0 %v341_v3  ;;  %v253_v34 = vld [vmem:[%s440_s4] ss:$0 sm:$0xff] }
  0x1c   :  { %63 = vperm.xlu0 %302, %v49_v2   ;;  %277 = vmatpush3.bf16.msra.mxu0 %v304_v16  ;;  %v254_v39 = vld [vmem:[%s442_s6] ss:$0 sm:$0xff] }
  0x1d   :  { %278 = vmatprep.subr.bf16.mxu0 %v342_v4  ;;  %v263_v44 = vld [vmem:[%s443_s7] ss:$0 sm:$0xff] }
  0x1e   :  { %v264_v48 = vld [vmem:[#allocation2] ss:$0 sm:$0xff] }
  0x20   :  { %279 = vmatpush3.bf16.msra.mxu0 %v305_v17 }
  0x21   :  { %280 = vmatprep.subr.bf16.mxu0 %v342_v4 }
  0x24   :  { %281 = vmatpush3.bf16.msra.mxu0 %v306_v18 }
  0x25   :  { %282 = vmatprep.subr.bf16.mxu0 %v342_v4 }
  0x28   :  { %283 = vmatpush3.bf16.msra.mxu0 %v307_v19 }
  0x29   :  { %284 = vmatprep.subr.bf16.mxu0 %v342_v4 }
  0x2c   :  { %285 = vmatpush3.bf16.msra.mxu0 %v308_v20 }
  0x2d   :  { %286 = vmatprep.subr.bf16.mxu0 %v342_v4 }
  0x30   :  { %287 = vmatpush3.bf16.msra.mxu0 %v309_v21 }
  0x31   :  { %288 = vmatprep.subr.bf16.mxu0 %v342_v4 }
  0x34   :  { %289 = vmatpush3.bf16.msra.mxu0 %v310_v22 }
  0x96   :  { %v54_v5 = vpop.permute.xlu0 %53 }
  0x97   :  { %v60_v9 = vmul.f32 %v249_v6, %v54_v5 }
  0x9b   :  { %v64_v8 = vpop.permute.xlu0 %63 }
  0x9c   :  { %v70_v10 = vmul.f32 %v250_v7, %v64_v8 }
  0x9e   :  { %v71_v12 = vadd.f32 %v70_v10, %v60_v9 }
  0xa0   :  { %v79_v13 = vadd.f32 %v251_v11, %v71_v12 }
  0xa2   :  { %80 = vadd.xlane.f32.xlu1 %v79_v13  ;;  %v84_v14 = vmul.f32 %v79_v13, %v79_v13 }
  0xa6   :  { %85 = vadd.xlane.f32.xlu1 %v84_v14 }
 0x12f   :  { %v81_v23 = vpop.xlane.xlu1 %80 }
 0x130   :  { %v83_v24 = vmul.f32 0.0078125, %v81_v23 }
 0x132   :  { %v88_v26 = vmul.f32 %v83_v24, %v83_v24  ;;  %v92_v30 = vsub.f32 %v79_v13, %v83_v24 }
 0x133   :  { %v86_v25 = vpop.xlane.xlu1 %85 }
 0x134   :  { %v87_v27 = vmul.f32 0.0078125, %v86_v25 }
 0x136   :  { %v89_v28 = vsub.f32 %v87_v27, %v88_v26 }
 0x138   :  { %v90_v29 = vadd.f32 1e-05, %v89_v28 }
 0x13a   :  { %311 = vrsqrt.f32 %v90_v29 }
 0x144   :  { %v312_v31 = vpop.eup %311 }
 0x145   :  { %v93_v33 = vmul.f32 %v312_v31, %v92_v30 }
 0x147   :  { %v101_v35 = vmul.f32 %v252_v32, %v93_v33 }
 0x149   :  { %v109_v36 = vadd.f32 %v253_v34, %v101_v35 }
 0x14b   :  { %v110_v37 = vmax.f32 %v109_v36, 0.0 }
 0x14d   :  { %v111_v38 = vpack.c.bf16 %v110_v37, %v110_v37 }
 0x14f   :  { %291 = vmatmul.mubr.bf16.vlgmr.msra.gmra.mrb[0].mxu0 %v111_v38 }
 0x222   :  { %v217_v40 = vpop.f32.mrb[0].mxu0 }
 0x223   :  { %v218_v41 = vadd.f32 %v254_v39, %v217_v40  ;;  %v292_v42 = vpop.f32.mrb[1].mxu0 }
 0x224   :  { %v220_v43 = vpop.f32.mrb[2].mxu0 }
 0x225   :  { %v223_v45 = vmax.f32 %v218_v41, 0.0  ;;  %v293_v46 = vpop.f32.mrb[3].mxu0 }
 0x227   :  { %v231_v47 = vmul.f32 %v263_v44, %v223_v45 }
 0x229   :  { %232 = vadd.xlane.f32.xlu1 %v231_v47 }
 0x2b6   :  { %v233_v49 = vpop.xlane.xlu1 %232 }
 0x2b7   :  { %v241_v50 = vadd.f32 %v264_v48, %v233_v49 }
 0x2b9   :  { %243 = vst.msk [vmem:[%s445_s9] sm:$0xff] %vm242_vm1, %v241_v50 }
 0x2ba   :  { %248 = vsyncpa [#allocation4], 1 }

</bundles_post_ra>
